<compile_context>
chip_gen: v5e
topology: v5e:2x2
jax: 0.10.0
libtpu: 0.0.40
codegen_flags: <defaults>
</compile_context>

<pallas_src>
import jax
import jax.numpy as jnp
from jax.experimental import pallas as pl
from jax.experimental.pallas import tpu as pltpu

LANE = 128
SUBLANE = 8


def _round_up(x, m):
    return ((x + m - 1) // m) * m


# ----------------------------------------------------------------------------
# Kernel: one LSTM-cell step per grid iteration; weights resident in VMEM.
# ----------------------------------------------------------------------------
def xlstm_seq_kernel(x_ref, h0_ref, c0_ref, wx_ref, wh_ref, b_ref,
                     h_seq_ref, c_last_ref, h_scr, c_scr):
    t = pl.program_id(0)

    @pl.when(t == 0)
    def _():
        h_scr[...] = h0_ref[...].astype(jnp.float32)
        c_scr[...] = c0_ref[...].astype(jnp.float32)

    h = h_scr[...]
    c = c_scr[...]

    # gates = x @ Wx + h @ Wh + b   (two MXU pushes, no in-kernel concat)
    gates = jnp.dot(x_ref[...].astype(wx_ref.dtype), wx_ref[...],
                    preferred_element_type=jnp.float32)
    gates = gates + jnp.dot(h.astype(wh_ref.dtype), wh_ref[...],
                            preferred_element_type=jnp.float32)
    gates = gates + b_ref[...]

    hp = h_scr.shape[-1]                      # padded hidden (multiple of 128)
    ingate     = jax.nn.sigmoid(gates[:, 0 * hp:1 * hp])
    forgetgate = jax.nn.sigmoid(gates[:, 1 * hp:2 * hp])
    cellgate   = jnp.tanh(gates[:, 2 * hp:3 * hp])
    outgate    = jax.nn.sigmoid(gates[:, 3 * hp:4 * hp])

    c_new = forgetgate * c + ingate * cellgate
    h_new = outgate * jnp.tanh(c_new)

    h_scr[...] = h_new
    c_scr[...] = c_new
    h_seq_ref[...] = h_new.astype(h_seq_ref.dtype)
    # c_last block is resident (same block index every step); only the final
    # value is flushed to HBM when the grid ends.
    c_last_ref[...] = c_new.astype(c_last_ref.dtype)


# ----------------------------------------------------------------------------
# Parameter prep (runs once): transpose, pre-sum bias, pad to lane tiles.
# ----------------------------------------------------------------------------
def prepare_params(params, input_dim, hidden_dim):
    """params = (wi (4H,D), bi (4H,), wh (4H,H), bh (4H,)) as in nn.Linear."""
    wi, bi, wh, bh = params
    D, H = input_dim, hidden_dim
    Dp, Hp = _round_up(D, LANE), _round_up(H, LANE)

    wi_t = wi.T.astype(jnp.float32)            # (D, 4H)
    wh_t = wh.T.astype(jnp.float32)            # (H, 4H)
    b_sum = (bi + bh).astype(jnp.float32)      # (4H,)

    # Transposed, gate-padded weights: columns are 4 gate slots of width Hp
    # each (padding rows/columns are zero, so padded lanes stay exactly 0).
    wx = jnp.zeros((Dp, 4 * Hp), jnp.float32)
    whp = jnp.zeros((Hp, 4 * Hp), jnp.float32)
    b = jnp.zeros((1, 4 * Hp), jnp.float32)
    for g in range(4):
        wx = wx.at[:D, g * Hp:g * Hp + H].set(wi_t[:, g * H:(g + 1) * H])
        whp = whp.at[:H, g * Hp:g * Hp + H].set(wh_t[:, g * H:(g + 1) * H])
        b = b.at[0, g * Hp:g * Hp + H].set(b_sum[g * H:(g + 1) * H])

    return dict(wx=wx, wh=whp, b=b, D=D, H=H, Dp=Dp, Hp=Hp)


# ----------------------------------------------------------------------------
# Wrappers
# ----------------------------------------------------------------------------
def xlstm_sequence(x_seq, hidden, prep):
    """Run T LSTM-cell steps in one pallas_call; weights stay in VMEM.

    x_seq: (T, B, D).  Returns (h_seq (T,B,H), (h_T, c_T))."""
    h0, c0 = hidden
    T, B, D = x_seq.shape
    H, Dp, Hp = prep["H"], prep["Dp"], prep["Hp"]
    wx, wh, b = prep["wx"], prep["wh"], prep["b"]
    Bp = _round_up(B, SUBLANE)

    if D != Dp:
        x_seq = jnp.pad(x_seq, ((0, 0), (0, 0), (0, Dp - D)))
    if H != Hp:
        h0 = jnp.pad(h0, ((0, 0), (0, Hp - H)))
        c0 = jnp.pad(c0, ((0, 0), (0, Hp - H)))
    if B != Bp:
        x_seq = jnp.pad(x_seq, ((0, 0), (0, Bp - B), (0, 0)))
        h0 = jnp.pad(h0, ((0, Bp - B), (0, 0)))
        c0 = jnp.pad(c0, ((0, Bp - B), (0, 0)))

    cost = pl.CostEstimate(
        flops=int(2 * T * Bp * (Dp + Hp) * 4 * Hp),
        transcendentals=int(5 * T * Bp * Hp),
        bytes_accessed=int(
            x_seq.size * x_seq.dtype.itemsize
            + (wx.size + wh.size + b.size) * 4
            + (h0.size + c0.size) * 4
            + T * Bp * Hp * x_seq.dtype.itemsize       # h_seq out
            + Bp * Hp * c0.dtype.itemsize))            # c_last out

    h_seq_p, c_last_p = pl.pallas_call(
        xlstm_seq_kernel,
        out_shape=(
            jax.ShapeDtypeStruct((T, Bp, Hp), x_seq.dtype),
            jax.ShapeDtypeStruct((Bp, Hp), c0.dtype),   # final cell state
        ),
        grid_spec=pltpu.PrefetchScalarGridSpec(
            num_scalar_prefetch=0,
            grid=(T,),
            in_specs=[
                pl.BlockSpec((None, Bp, Dp), lambda t: (t, 0, 0)),   # x_t
                pl.BlockSpec((Bp, Hp), lambda t: (0, 0)),            # h0 (resident)
                pl.BlockSpec((Bp, Hp), lambda t: (0, 0)),            # c0 (resident)
                pl.BlockSpec((Dp, 4 * Hp), lambda t: (0, 0)),        # Wx (resident)
                pl.BlockSpec((Hp, 4 * Hp), lambda t: (0, 0)),        # Wh (resident)
                pl.BlockSpec((1, 4 * Hp), lambda t: (0, 0)),         # b  (resident)
            ],
            out_specs=[
                pl.BlockSpec((None, Bp, Hp), lambda t: (t, 0, 0)),   # h per step
                pl.BlockSpec((Bp, Hp), lambda t: (0, 0)),            # final c
            ],
            scratch_shapes=[
                pltpu.VMEM((Bp, Hp), jnp.float32),   # carried h
                pltpu.VMEM((Bp, Hp), jnp.float32),   # carried c (always f32)
            ],
        ),
        compiler_params=pltpu.CompilerParams(
            dimension_semantics=("arbitrary",)),      # time is a recurrence
        cost_estimate=cost,
    )(x_seq, h0, c0, wx, wh, b)

    h_seq = h_seq_p[:, :B, :H]
    c_last = c_last_p[:B, :H]
    return h_seq, (h_seq[-1], c_last)


def xlstm_cell(x, hidden, prep):
    """Module-equivalent single-step forward: returns (h_new, (h_new, c_new))."""
    h_seq, (_, c_new) = xlstm_sequence(x[None], hidden, prep)
    h_new = h_seq[0]
    return h_new, (h_new, c_new)


# ----------------------------------------------------------------------------
# Init + pure-JAX reference
# ----------------------------------------------------------------------------
def init_params(key, input_dim, hidden_dim):
    """nn.Linear-style shapes, uniform +/- 1/sqrt(fan_in)."""
    k1, k2, k3, k4 = jax.random.split(key, 4)
    bound_i = 1.0 / jnp.sqrt(input_dim)
    bound_h = 1.0 / jnp.sqrt(hidden_dim)
    wi = jax.random.uniform(k1, (4 * hidden_dim, input_dim), jnp.float32,
                            -bound_i, bound_i)
    bi = jax.random.uniform(k2, (4 * hidden_dim,), jnp.float32, -bound_i, bound_i)
    wh = jax.random.uniform(k3, (4 * hidden_dim, hidden_dim), jnp.float32,
                            -bound_h, bound_h)
    bh = jax.random.uniform(k4, (4 * hidden_dim,), jnp.float32, -bound_h, bound_h)
    return wi, bi, wh, bh


def reference(x, hidden, params):
    h, c = hidden
    wi, bi, wh, bh = params
    gates = x @ wi.T + bi + h @ wh.T + bh
    H = h.shape[1]
    i = jax.nn.sigmoid(gates[:, 0 * H:1 * H])
    f = jax.nn.sigmoid(gates[:, 1 * H:2 * H])
    g = jnp.tanh(gates[:, 2 * H:3 * H])
    o = jax.nn.sigmoid(gates[:, 3 * H:4 * H])
    c_new = f * c + i * g
    h_new = o * jnp.tanh(c_new)
    return h_new, (h_new, c_new)


def reference_sequence(x_seq, hidden, params):
    h, c = hidden
    hs = []
    for t in range(x_seq.shape[0]):
        h, (_, c) = reference(x_seq[t], (h, c), params)
        hs.append(h)
    return jnp.stack(hs, 0), h, c


if __name__ == "__main__":
    B, INPUT_DIM, HIDDEN_DIM, T = 8, 32, 32, 6

    key = jax.random.PRNGKey(0)
    kx, kh, kc, kp = jax.random.split(key, 4)
    x_seq = jax.random.normal(kx, (T, B, INPUT_DIM), jnp.float32)
    h0 = jax.random.normal(kh, (B, HIDDEN_DIM), jnp.float32)
    c0 = jax.random.normal(kc, (B, HIDDEN_DIM), jnp.float32)
    params = init_params(kp, INPUT_DIM, HIDDEN_DIM)
    prep = prepare_params(params, INPUT_DIM, HIDDEN_DIM)

    # --- single-step (PyTorch-module-equivalent) forward -------------------
    out, (h1, c1) = xlstm_cell(x_seq[0], (h0, c0), prep)
    jax.block_until_ready((out, h1, c1))
    ref_out, (ref_h1, ref_c1) = reference(x_seq[0], (h0, c0), params)
    assert jnp.allclose(out, ref_out, atol=3e-5, rtol=3e-5)
    assert jnp.allclose(c1, ref_c1, atol=3e-5, rtol=3e-5)

    # --- full sequence in one pallas_call (weights resident across T) ------
    h_seq, (hT, cT) = xlstm_sequence(x_seq, (h0, c0), prep)
    jax.block_until_ready((h_seq, hT, cT))
    ref_hs, ref_hT, ref_cT = reference_sequence(x_seq, (h0, c0), params)
    assert jnp.allclose(h_seq, ref_hs, atol=3e-5, rtol=3e-5)
    assert jnp.allclose(hT, ref_hT, atol=3e-5, rtol=3e-5)
    assert jnp.allclose(cT, ref_cT, atol=3e-5, rtol=3e-5)

    print("KERNEL_OK")
</pallas_src>

<mosaic_0001>
module attributes {stable_mosaic.version = 11 : i64} {
  func.func @xlstm_seq_kernel(%arg0: i32, %arg1: memref<1x8x128xf32, #tpu.memory_space<vmem>>, %arg2: memref<8x128xf32, #tpu.memory_space<vmem>>, %arg3: memref<8x128xf32, #tpu.memory_space<vmem>>, %arg4: memref<128x512xf32, #tpu.memory_space<vmem>>, %arg5: memref<128x512xf32, #tpu.memory_space<vmem>>, %arg6: memref<1x512xf32, #tpu.memory_space<vmem>>, %arg7: memref<1x8x128xf32, #tpu.memory_space<vmem>>, %arg8: memref<8x128xf32, #tpu.memory_space<vmem>>, %arg9: memref<8x128xf32, #tpu.memory_space<vmem>>, %arg10: memref<8x128xf32, #tpu.memory_space<vmem>>) attributes {dimension_semantics = [#tpu.dimension_semantics<arbitrary>], iteration_bounds = array<i64: 1>, scalar_prefetch = 0 : i64, scratch_operands = 2 : i64, tpu.core_type = #tpu.core_type<tc>, window_params = [{transform_indices = @transform_0, window_bounds = array<i64: 1, 8, 128>}, {pipeline_mode = #tpu.pipeline_mode<synchronous>, transform_indices = @transform_1, window_bounds = array<i64: 8, 128>}, {pipeline_mode = #tpu.pipeline_mode<synchronous>, transform_indices = @transform_2, window_bounds = array<i64: 8, 128>}, {pipeline_mode = #tpu.pipeline_mode<synchronous>, transform_indices = @transform_3, window_bounds = array<i64: 128, 512>}, {pipeline_mode = #tpu.pipeline_mode<synchronous>, transform_indices = @transform_4, window_bounds = array<i64: 128, 512>}, {pipeline_mode = #tpu.pipeline_mode<synchronous>, transform_indices = @transform_5, window_bounds = array<i64: 1, 512>}, {transform_indices = @transform_6, window_bounds = array<i64: 1, 8, 128>}, {pipeline_mode = #tpu.pipeline_mode<synchronous>, transform_indices = @transform_7, window_bounds = array<i64: 8, 128>}]} {
    %c0_i32 = arith.constant 0 : i32
    %0 = arith.cmpi eq, %arg0, %c0_i32 : i32
    %1 = arith.extui %0 : i1 to i32
    %c0_i32_0 = arith.constant 0 : i32
    %2 = arith.cmpi ne, %1, %c0_i32_0 : i32
    scf.if %2 {
      %c0_26 = arith.constant 0 : index
      %c0_27 = arith.constant 0 : index
      %46 = vector.load %arg2[%c0_26, %c0_27] : memref<8x128xf32, #tpu.memory_space<vmem>>, vector<8x128xf32>
      %c0_28 = arith.constant 0 : index
      %c0_29 = arith.constant 0 : index
      %47 = vector.load %arg9[%c0_28, %c0_29] : memref<8x128xf32, #tpu.memory_space<vmem>>, vector<8x128xf32>
      tpu.vector_store %arg9[%c0_28, %c0_29], %46 {strides = array<i32>} : memref<8x128xf32, #tpu.memory_space<vmem>>, vector<8x128xf32>,
      %c0_30 = arith.constant 0 : index
      %c0_31 = arith.constant 0 : index
      %48 = vector.load %arg3[%c0_30, %c0_31] : memref<8x128xf32, #tpu.memory_space<vmem>>, vector<8x128xf32>
      %c0_32 = arith.constant 0 : index
      %c0_33 = arith.constant 0 : index
      %49 = vector.load %arg10[%c0_32, %c0_33] : memref<8x128xf32, #tpu.memory_space<vmem>>, vector<8x128xf32>
      tpu.vector_store %arg10[%c0_32, %c0_33], %48 {strides = array<i32>} : memref<8x128xf32, #tpu.memory_space<vmem>>, vector<8x128xf32>,
    } else {
    }
    %c0 = arith.constant 0 : index
    %c0_1 = arith.constant 0 : index
    %3 = vector.load %arg9[%c0, %c0_1] : memref<8x128xf32, #tpu.memory_space<vmem>>, vector<8x128xf32>
    %c0_2 = arith.constant 0 : index
    %c0_3 = arith.constant 0 : index
    %4 = vector.load %arg10[%c0_2, %c0_3] : memref<8x128xf32, #tpu.memory_space<vmem>>, vector<8x128xf32>
    %c0_4 = arith.constant 0 : index
    %c0_5 = arith.constant 0 : index
    %c0_6 = arith.constant 0 : index
    %5 = vector.load %arg1[%c0_4, %c0_5, %c0_6] : memref<1x8x128xf32, #tpu.memory_space<vmem>>, vector<1x8x128xf32>
    %6 = vector.shape_cast %5 : vector<1x8x128xf32> to vector<8x128xf32>
    %c0_7 = arith.constant 0 : index
    %c0_8 = arith.constant 0 : index
    %7 = vector.load %arg4[%c0_7, %c0_8] : memref<128x512xf32, #tpu.memory_space<vmem>>, vector<128x512xf32>
    %cst = arith.constant dense<0.000000e+00> : vector<8x512xf32>
    %8 = tpu.matmul %6, %7, %cst {dimension_numbers = #tpu.dot_dimension_numbers<[1], [0], [0], [1], [0, 0, 1, 1], [], []>} : vector<8x128xf32>, vector<128x512xf32>, vector<8x512xf32> -> vector<8x512xf32>
    %c0_9 = arith.constant 0 : index
    %c0_10 = arith.constant 0 : index
    %9 = vector.load %arg5[%c0_9, %c0_10] : memref<128x512xf32, #tpu.memory_space<vmem>>, vector<128x512xf32>
    %cst_11 = arith.constant dense<0.000000e+00> : vector<8x512xf32>
    %10 = tpu.matmul %3, %9, %cst_11 {dimension_numbers = #tpu.dot_dimension_numbers<[1], [0], [0], [1], [0, 0, 1, 1], [], []>} : vector<8x128xf32>, vector<128x512xf32>, vector<8x512xf32> -> vector<8x512xf32>
    %11 = arith.addf %8, %10 : vector<8x512xf32>
    %c0_12 = arith.constant 0 : index
    %c0_13 = arith.constant 0 : index
    %12 = vector.load %arg6[%c0_12, %c0_13] : memref<1x512xf32, #tpu.memory_space<vmem>>, vector<1x512xf32>
    %13 = vector.broadcast %12 : vector<1x512xf32> to vector<8x512xf32>
    %14 = arith.addf %11, %13 : vector<8x512xf32>
    %15 = vector.extract_strided_slice %14 {offsets = [0, 0], sizes = [8, 128], strides = [1, 1]} : vector<8x512xf32> to vector<8x128xf32>
    %16 = arith.negf %15 : vector<8x128xf32>
    %17 = math.exp %16 : vector<8x128xf32>
    %cst_14 = arith.constant 1.000000e+00 : f32
    %18 = vector.broadcast %cst_14 : f32 to vector<8x128xf32>
    %19 = arith.addf %18, %17 : vector<8x128xf32>
    %20 = arith.divf %18, %19 : vector<8x128xf32>
    %21 = vector.extract_strided_slice %14 {offsets = [0, 128], sizes = [8, 128], strides = [1, 1]} : vector<8x512xf32> to vector<8x128xf32>
    %22 = arith.negf %21 : vector<8x128xf32>
    %23 = math.exp %22 : vector<8x128xf32>
    %cst_15 = arith.constant 1.000000e+00 : f32
    %24 = vector.broadcast %cst_15 : f32 to vector<8x128xf32>
    %25 = arith.addf %24, %23 : vector<8x128xf32>
    %26 = arith.divf %24, %25 : vector<8x128xf32>
    %27 = vector.extract_strided_slice %14 {offsets = [0, 256], sizes = [8, 128], strides = [1, 1]} : vector<8x512xf32> to vector<8x128xf32>
    %28 = math.tanh %27 : vector<8x128xf32>
    %29 = vector.extract_strided_slice %14 {offsets = [0, 384], sizes = [8, 128], strides = [1, 1]} : vector<8x512xf32> to vector<8x128xf32>
    %30 = arith.negf %29 : vector<8x128xf32>
    %31 = math.exp %30 : vector<8x128xf32>
    %cst_16 = arith.constant 1.000000e+00 : f32
    %32 = vector.broadcast %cst_16 : f32 to vector<8x128xf32>
    %33 = arith.addf %32, %31 : vector<8x128xf32>
    %34 = arith.divf %32, %33 : vector<8x128xf32>
    %35 = arith.mulf %26, %4 : vector<8x128xf32>
    %36 = arith.mulf %20, %28 : vector<8x128xf32>
    %37 = arith.addf %35, %36 : vector<8x128xf32>
    %38 = math.tanh %37 : vector<8x128xf32>
    %39 = arith.mulf %34, %38 : vector<8x128xf32>
    %c0_17 = arith.constant 0 : index
    %c0_18 = arith.constant 0 : index
    %40 = vector.load %arg9[%c0_17, %c0_18] : memref<8x128xf32, #tpu.memory_space<vmem>>, vector<8x128xf32>
    tpu.vector_store %arg9[%c0_17, %c0_18], %39 {strides = array<i32>} : memref<8x128xf32, #tpu.memory_space<vmem>>, vector<8x128xf32>,
    %c0_19 = arith.constant 0 : index
    %c0_20 = arith.constant 0 : index
    %41 = vector.load %arg10[%c0_19, %c0_20] : memref<8x128xf32, #tpu.memory_space<vmem>>, vector<8x128xf32>
    tpu.vector_store %arg10[%c0_19, %c0_20], %37 {strides = array<i32>} : memref<8x128xf32, #tpu.memory_space<vmem>>, vector<8x128xf32>,
    %c0_21 = arith.constant 0 : index
    %c0_22 = arith.constant 0 : index
    %c0_23 = arith.constant 0 : index
    %42 = vector.load %arg7[%c0_21, %c0_22, %c0_23] : memref<1x8x128xf32, #tpu.memory_space<vmem>>, vector<1x8x128xf32>
    %43 = vector.shape_cast %42 : vector<1x8x128xf32> to vector<8x128xf32>
    %44 = vector.shape_cast %39 : vector<8x128xf32> to vector<1x8x128xf32>
    tpu.vector_store %arg7[%c0_21, %c0_22, %c0_23], %44 {strides = array<i32>} : memref<1x8x128xf32, #tpu.memory_space<vmem>>, vector<1x8x128xf32>,
    %c0_24 = arith.constant 0 : index
    %c0_25 = arith.constant 0 : index
    %45 = vector.load %arg8[%c0_24, %c0_25] : memref<8x128xf32, #tpu.memory_space<vmem>>, vector<8x128xf32>
    tpu.vector_store %arg8[%c0_24, %c0_25], %37 {strides = array<i32>} : memref<8x128xf32, #tpu.memory_space<vmem>>, vector<8x128xf32>,
    return
  }
  func.func @transform_0(%arg0: i32) -> (i32, i32, i32) {
    %c0_i32 = arith.constant 0 : i32
    %c0_i32_0 = arith.constant 0 : i32
    %c0_i32_1 = arith.constant 0 : i32
    return %arg0, %c0_i32, %c0_i32_0 : i32, i32, i32
  }
  func.func @transform_1(%arg0: i32) -> (i32, i32) {
    %c0_i32 = arith.constant 0 : i32
    %c0_i32_0 = arith.constant 0 : i32
    %c0_i32_1 = arith.constant 0 : i32
    return %c0_i32, %c0_i32_0 : i32, i32
  }
  func.func @transform_2(%arg0: i32) -> (i32, i32) {
    %c0_i32 = arith.constant 0 : i32
    %c0_i32_0 = arith.constant 0 : i32
    %c0_i32_1 = arith.constant 0 : i32
    return %c0_i32, %c0_i32_0 : i32, i32
  }
  func.func @transform_3(%arg0: i32) -> (i32, i32) {
    %c0_i32 = arith.constant 0 : i32
    %c0_i32_0 = arith.constant 0 : i32
    %c0_i32_1 = arith.constant 0 : i32
    return %c0_i32, %c0_i32_0 : i32, i32
  }
  func.func @transform_4(%arg0: i32) -> (i32, i32) {
    %c0_i32 = arith.constant 0 : i32
    %c0_i32_0 = arith.constant 0 : i32
    %c0_i32_1 = arith.constant 0 : i32
    return %c0_i32, %c0_i32_0 : i32, i32
  }
  func.func @transform_5(%arg0: i32) -> (i32, i32) {
    %c0_i32 = arith.constant 0 : i32
    %c0_i32_0 = arith.constant 0 : i32
    %c0_i32_1 = arith.constant 0 : i32
    return %c0_i32, %c0_i32_0 : i32, i32
  }
  func.func @transform_6(%arg0: i32) -> (i32, i32, i32) {
    %c0_i32 = arith.constant 0 : i32
    %c0_i32_0 = arith.constant 0 : i32
    %c0_i32_1 = arith.constant 0 : i32
    return %arg0, %c0_i32, %c0_i32_0 : i32, i32, i32
  }
  func.func @transform_7(%arg0: i32) -> (i32, i32) {
    %c0_i32 = arith.constant 0 : i32
    %c0_i32_0 = arith.constant 0 : i32
    %c0_i32_1 = arith.constant 0 : i32
    return %c0_i32, %c0_i32_0 : i32, i32
  }
}

</mosaic_0001>

<bundles_post_ra>
// kernel: tpu_custom_call.1
= control target key start
LH: loop header
LB: loop body
LE: loop exit
PB: predicated region body
PF: predicated region fallthrough
CT: control target
= control target key end

     0   :  { %13 = vsyncpa [#allocation5], 0  ;;  %s793_s0 = inlined_call_operand.hbm [shape: f32[1,8,128], index: 0, kind: input, shape index: {}]   ;;  %s794_s1 = inlined_call_operand.hbm [shape: f32[8,128], index: 1, kind: input, shape index: {}]   ;;  %s795_s2 = inlined_call_operand.hbm [shape: f32[8,128], index: 2, kind: input, shape index: {}]   ;;  %s796_s3 = inlined_call_operand.hbm [shape: f32[128,512], index: 3, kind: input, shape index: {}]   ;;  %s797_s4 = inlined_call_operand.hbm [shape: f32[128,512], index: 4, kind: input, shape index: {}]   ;;  %s798_s5 = inlined_call_operand.vmem [shape: f32[1,512], index: 5, kind: input, shape index: {}]   ;;  %s799_s6 = inlined_call_operand.hbm [shape: f32[1,8,128], index: 6, kind: output, shape index: {0}]   ;;  %s800_s7 = inlined_call_operand.hbm [shape: f32[8,128], index: 7, kind: output, shape index: {1}]  }
   0x1   :  { %14 = vsyncpa [#allocation8], 0 }
   0x2   :  { %15 = vsyncpa [#allocation11], 0 }
   0x3   :  { %16 = vsyncpa [#allocation6], 0  ;;  %s34_s26 = sshll.u32 %s794_s1, 4  ;;  %s35_s26 = int_to_ptr.hbm [resolvable:$true] %s34_s26 }
   0x4   :  { %17 = vsyncpa [#allocation15], 0  ;;  %s720_s27 = smov [#allocation7]   ;;  %s55_s8 = sshll.u32 %s796_s3, 4  ;;  %s56_s8 = int_to_ptr.hbm [resolvable:$true] %s55_s8 }
   0x5   :  { %s36_s28 = sshll.u32 %s720_s27, 4  ;;  %s721_s9 = smov [#allocation10]   ;;  %s37_s28 = int_to_ptr.vmem [resolvable:$true] %s36_s28 }
   0x6   :  { %39 = dma.hbm_to_vmem [thread:$0]  %s35_s26, 128, %s37_s28, [#allocation8]  }
   0x7   :  { %s57_s10 = sshll.u32 %s721_s9, 4  ;;  %s722_s11 = smov 512   ;;  %s58_s10 = int_to_ptr.vmem [resolvable:$true] %s57_s10 }
   0x8   :  { %s723_s12 = smov 32   ;;  %s23_s1 = sshll.u32 %s793_s0, 4  ;;  %s24_s1 = int_to_ptr.hbm [resolvable:$true] %s23_s1 }
   0x9   :  { %63 = dma.hbm_to_vmem [thread:$0]  %s56_s8, 8192, %s58_s10, [#allocation11], %s722_s11, %s722_s11, %s723_s12  }
   0xa   :  { %s724_s15 = smov [#allocation4]   ;;  %s45_s3 = sshll.u32 %s795_s2, 4  ;;  %s46_s3 = int_to_ptr.hbm [resolvable:$true] %s45_s3 }
   0xb   :  { %s25_s16 = sshll.u32 %s724_s15, 4  ;;  %s725_s19 = smov [#allocation9]   ;;  %s26_s16 = int_to_ptr.vmem [resolvable:$true] %s25_s16 }
   0xc   :  { %28 = dma.hbm_to_vmem [thread:$0]  %s24_s1, 128, %s26_s16, [#allocation5]  }
   0xd   :  { %s47_s20 = sshll.u32 %s725_s19, 4  ;;  %s68_s23 = sshll.u32 %s797_s4, 4  ;;  %s48_s20 = int_to_ptr.vmem [resolvable:$true] %s47_s20  ;;  %s69_s23 = int_to_ptr.hbm [resolvable:$true] %s68_s23 }
   0xe   :  { %50 = dma.hbm_to_vmem [thread:$0]  %s46_s3, 128, %s48_s20, [#allocation8]  }
   0xf   :  { %s726_s0 = smov [#allocation12]  }
  0x10   :  { %s70_s24 = sshll.u32 %s726_s0, 4  ;;  %s71_s24 = int_to_ptr.vmem [resolvable:$true] %s70_s24 }
  0x11   :  { %76 = dma.hbm_to_vmem [thread:$0]  %s69_s23, 8192, %s71_s24, [#allocation11], %s722_s11, %s722_s11, %s723_s12  }
  0x12   :  { %710 = dma.done.wait [#allocation5], 128  }
  0x13   :  { %711 = vsyncadd [#allocation5], 4294967168 }
  0x14   :  { %712 = dma.done.wait [#allocation8], 256  }
  0x15   :  { %713 = vsyncadd [#allocation8], 4294967040 }
  0x16   :  { %714 = dma.done.wait [#allocation11], 16384  }
  0x17   :  { %715 = vsyncadd [#allocation11], 4294950912  ;;  %v234_v0 = vld [vmem:[#allocation12 + $0x1e0] sm:$0xff]  ;;  %v235_v1 = vld [vmem:[#allocation12 + $0x1e8] sm:$0xff]  ;;  %s497_s28 = sshll.u32 %s800_s7, 4  ;;  %s728_s29 = smov [#allocation13]   ;;  %s498_s28 = int_to_ptr.hbm [resolvable:$true] %s497_s28 }
  0x18   :  { %v237_v2 = vld [vmem:[#allocation12 + $0x1f8] sm:$0xff]  ;;  %238 = vmatpush.msra.mxu0 %v234_v0  ;;  %258 = vmatpush.msra.mxu1 %v235_v1  ;;  %v230_v3 = vld [vmem:[#allocation12 + $0x1c0] sm:$0xff]  ;;  %v231_v4 = vld [vmem:[#allocation12 + $0x1c8] sm:$0xff]  ;;  %s484_s30 = sshll.u32 %s728_s29, 4  ;;  %s486_s9 = sshll.u32 %s799_s6, 4  ;;  %s485_s30 = int_to_ptr.vmem [resolvable:$true] %s484_s30  ;;  %s487_s9 = int_to_ptr.hbm [resolvable:$true] %s486_s9 }
  0x19   :  { %v233_v5 = vld [vmem:[#allocation12 + $0x1d8] sm:$0xff]  ;;  %298 = vmatpush.msra.mxu3 %v237_v2  ;;  %v226_v6 = vld [vmem:[#allocation12 + $0x1a0] sm:$0xff]  ;;  %v227_v7 = vld [vmem:[#allocation12 + $0x1a8] sm:$0xff] }
  0x1a   :  { %239 = vmatpush.msra.mxu0 %v230_v3  ;;  %259 = vmatpush.msra.mxu1 %v231_v4  ;;  %v229_v8 = vld [vmem:[#allocation12 + $0x1b8] sm:$0xff]  ;;  %v222_v9 = vld [vmem:[#allocation12 + $0x180] sm:$0xff]  ;;  %v223_v10 = vld [vmem:[#allocation12 + $0x188] sm:$0xff] }
  0x1b   :  { %299 = vmatpush.msra.mxu3 %v233_v5  ;;  %v236_v11 = vld [vmem:[#allocation12 + $0x1f0] sm:$0xff]  ;;  %v225_v12 = vld [vmem:[#allocation12 + $0x198] sm:$0xff]  ;;  %v218_v14 = vld [vmem:[#allocation12 + $0x160] sm:$0xff] }
  0x1c   :  { %240 = vmatpush.msra.mxu0 %v226_v6  ;;  %260 = vmatpush.msra.mxu1 %v227_v7  ;;  %v232_v13 = vld [vmem:[#allocation12 + $0x1d0] sm:$0xff]  ;;  %v219_v15 = vld [vmem:[#allocation12 + $0x168] sm:$0xff]  ;;  %v221_v16 = vld [vmem:[#allocation12 + $0x178] sm:$0xff] }
  0x1d   :  { %300 = vmatpush.msra.mxu3 %v229_v8  ;;  %278 = vmatpush.msra.mxu2 %v236_v11  ;;  %v228_v17 = vld [vmem:[#allocation12 + $0x1b0] sm:$0xff]  ;;  %v214_v18 = vld [vmem:[#allocation12 + $0x140] sm:$0xff]  ;;  %v215_v19 = vld [vmem:[#allocation12 + $0x148] sm:$0xff] }
  0x1e   :  { %241 = vmatpush.msra.mxu0 %v222_v9  ;;  %261 = vmatpush.msra.mxu1 %v223_v10  ;;  %v217_v20 = vld [vmem:[#allocation12 + $0x158] sm:$0xff]  ;;  %v224_v21 = vld [vmem:[#allocation12 + $0x190] sm:$0xff]  ;;  %v210_v22 = vld [vmem:[#allocation12 + $0x120] sm:$0xff] }
  0x1f   :  { %301 = vmatpush.msra.mxu3 %v225_v12  ;;  %279 = vmatpush.msra.mxu2 %v232_v13  ;;  %v211_v23 = vld [vmem:[#allocation12 + $0x128] sm:$0xff]  ;;  %v213_v24 = vld [vmem:[#allocation12 + $0x138] sm:$0xff]  ;;  %v220_v25 = vld [vmem:[#allocation12 + $0x170] sm:$0xff] }
  0x20   :  { %242 = vmatpush.msra.mxu0 %v218_v14  ;;  %262 = vmatpush.msra.mxu1 %v219_v15  ;;  %v206_v26 = vld [vmem:[#allocation12 + $0x100] sm:$0xff]  ;;  %v207_v27 = vld [vmem:[#allocation12 + $0x108] sm:$0xff]  ;;  %v209_v28 = vld [vmem:[#allocation12 + $0x118] sm:$0xff] }
  0x21   :  { %302 = vmatpush.msra.mxu3 %v221_v16  ;;  %280 = vmatpush.msra.mxu2 %v228_v17  ;;  %v216_v29 = vld [vmem:[#allocation12 + $0x150] sm:$0xff]  ;;  %v202_v30 = vld [vmem:[#allocation12 + $0xe0] sm:$0xff]  ;;  %v203_v31 = vld [vmem:[#allocation12 + $0xe8] sm:$0xff] }
  0x22   :  { %243 = vmatpush.msra.mxu0 %v214_v18  ;;  %263 = vmatpush.msra.mxu1 %v215_v19  ;;  %v205_v32 = vld [vmem:[#allocation12 + $0xf8] sm:$0xff]  ;;  %v212_v33 = vld [vmem:[#allocation12 + $0x130] sm:$0xff]  ;;  %v198_v34 = vld [vmem:[#allocation12 + $0xc0] sm:$0xff] }
  0x23   :  { %303 = vmatpush.msra.mxu3 %v217_v20  ;;  %281 = vmatpush.msra.mxu2 %v224_v21  ;;  %v199_v35 = vld [vmem:[#allocation12 + $0xc8] sm:$0xff]  ;;  %v201_v36 = vld [vmem:[#allocation12 + $0xd8] sm:$0xff]  ;;  %v208_v37 = vld [vmem:[#allocation12 + $0x110] sm:$0xff] }
  0x24   :  { %244 = vmatpush.msra.mxu0 %v210_v22  ;;  %264 = vmatpush.msra.mxu1 %v211_v23  ;;  %v194_v38 = vld [vmem:[#allocation12 + $0xa0] sm:$0xff]  ;;  %v195_v39 = vld [vmem:[#allocation12 + $0xa8] sm:$0xff]  ;;  %v197_v40 = vld [vmem:[#allocation12 + $0xb8] sm:$0xff] }
  0x25   :  { %304 = vmatpush.msra.mxu3 %v213_v24  ;;  %282 = vmatpush.msra.mxu2 %v220_v25  ;;  %v204_v41 = vld [vmem:[#allocation12 + $0xf0] sm:$0xff]  ;;  %v190_v42 = vld [vmem:[#allocation12 + $0x80] sm:$0xff]  ;;  %v191_v43 = vld [vmem:[#allocation12 + $0x88] sm:$0xff] }
  0x26   :  { %245 = vmatpush.msra.mxu0 %v206_v26  ;;  %265 = vmatpush.msra.mxu1 %v207_v27  ;;  %v193_v44 = vld [vmem:[#allocation12 + $0x98] sm:$0xff]  ;;  %v200_v45 = vld [vmem:[#allocation12 + $0xd0] sm:$0xff]  ;;  %v186_v46 = vld [vmem:[#allocation12 + $0x60] sm:$0xff] }
  0x27   :  { %305 = vmatpush.msra.mxu3 %v209_v28  ;;  %283 = vmatpush.msra.mxu2 %v216_v29  ;;  %v187_v47 = vld [vmem:[#allocation12 + $0x68] sm:$0xff]  ;;  %v189_v48 = vld [vmem:[#allocation12 + $0x78] sm:$0xff]  ;;  %v196_v49 = vld [vmem:[#allocation12 + $0xb0] sm:$0xff] }
  0x28   :  { %246 = vmatpush.msra.mxu0 %v202_v30  ;;  %266 = vmatpush.msra.mxu1 %v203_v31  ;;  %v182_v50 = vld [vmem:[#allocation12 + $0x40] sm:$0xff]  ;;  %v183_v51 = vld [vmem:[#allocation12 + $0x48] sm:$0xff]  ;;  %v185_v52 = vld [vmem:[#allocation12 + $0x58] sm:$0xff] }
  0x29   :  { %306 = vmatpush.msra.mxu3 %v205_v32  ;;  %284 = vmatpush.msra.mxu2 %v212_v33  ;;  %v192_v53 = vld [vmem:[#allocation12 + $0x90] sm:$0xff]  ;;  %v178_v54 = vld [vmem:[#allocation12 + $0x20] sm:$0xff]  ;;  %v179_v55 = vld [vmem:[#allocation12 + $0x28] sm:$0xff] }
  0x2a   :  { %247 = vmatpush.msra.mxu0 %v198_v34  ;;  %267 = vmatpush.msra.mxu1 %v199_v35  ;;  %v181_v56 = vld [vmem:[#allocation12 + $0x38] sm:$0xff]  ;;  %v188_v57 = vld [vmem:[#allocation12 + $0x70] sm:$0xff]  ;;  %v174_v58 = vld [vmem:[#allocation12] sm:$0xff] }
  0x2b   :  { %307 = vmatpush.msra.mxu3 %v201_v36  ;;  %285 = vmatpush.msra.mxu2 %v208_v37  ;;  %v175_v59 = vld [vmem:[#allocation12 + $0x8] sm:$0xff]  ;;  %v177_v60 = vld [vmem:[#allocation12 + $0x18] sm:$0xff]  ;;  %v170_v61 = vld [vmem:[#allocation10 + $0x1e0] sm:$0xff] }
  0x2c   :  { %248 = vmatpush.msra.mxu0 %v194_v38  ;;  %268 = vmatpush.msra.mxu1 %v195_v39  ;;  %v171_v62 = vld [vmem:[#allocation10 + $0x1e8] sm:$0xff]  ;;  %v173_v63 = vld [vmem:[#allocation10 + $0x1f8] sm:$0xff]  ;;  %v184_v0 = vld [vmem:[#allocation12 + $0x50] sm:$0xff] }
  0x2d   :  { %308 = vmatpush.msra.mxu3 %v197_v40  ;;  %286 = vmatpush.msra.mxu2 %v204_v41  ;;  %v166_v1 = vld [vmem:[#allocation10 + $0x1c0] sm:$0xff]  ;;  %v167_v2 = vld [vmem:[#allocation10 + $0x1c8] sm:$0xff]  ;;  %v169_v3 = vld [vmem:[#allocation10 + $0x1d8] sm:$0xff] }
  0x2e   :  { %249 = vmatpush.msra.mxu0 %v190_v42  ;;  %269 = vmatpush.msra.mxu1 %v191_v43  ;;  %v180_v4 = vld [vmem:[#allocation12 + $0x30] sm:$0xff]  ;;  %v162_v5 = vld [vmem:[#allocation10 + $0x1a0] sm:$0xff]  ;;  %v163_v6 = vld [vmem:[#allocation10 + $0x1a8] sm:$0xff] }
  0x2f   :  { %309 = vmatpush.msra.mxu3 %v193_v44  ;;  %287 = vmatpush.msra.mxu2 %v200_v45  ;;  %v165_v7 = vld [vmem:[#allocation10 + $0x1b8] sm:$0xff]  ;;  %v176_v8 = vld [vmem:[#allocation12 + $0x10] sm:$0xff]  ;;  %v158_v9 = vld [vmem:[#allocation10 + $0x180] sm:$0xff] }
  0x30   :  { %250 = vmatpush.msra.mxu0 %v186_v46  ;;  %270 = vmatpush.msra.mxu1 %v187_v47  ;;  %v159_v10 = vld [vmem:[#allocation10 + $0x188] sm:$0xff]  ;;  %v161_v11 = vld [vmem:[#allocation10 + $0x198] sm:$0xff]  ;;  %v172_v12 = vld [vmem:[#allocation10 + $0x1f0] sm:$0xff] }
  0x31   :  { %310 = vmatpush.msra.mxu3 %v189_v48  ;;  %288 = vmatpush.msra.mxu2 %v196_v49  ;;  %v154_v13 = vld [vmem:[#allocation10 + $0x160] sm:$0xff]  ;;  %v155_v14 = vld [vmem:[#allocation10 + $0x168] sm:$0xff]  ;;  %v157_v15 = vld [vmem:[#allocation10 + $0x178] sm:$0xff] }
  0x32   :  { %251 = vmatpush.msra.mxu0 %v182_v50  ;;  %271 = vmatpush.msra.mxu1 %v183_v51  ;;  %v168_v16 = vld [vmem:[#allocation10 + $0x1d0] sm:$0xff]  ;;  %v150_v17 = vld [vmem:[#allocation10 + $0x140] sm:$0xff]  ;;  %v151_v18 = vld [vmem:[#allocation10 + $0x148] sm:$0xff] }
  0x33   :  { %311 = vmatpush.msra.mxu3 %v185_v52  ;;  %289 = vmatpush.msra.mxu2 %v192_v53  ;;  %v153_v19 = vld [vmem:[#allocation10 + $0x158] sm:$0xff]  ;;  %v164_v20 = vld [vmem:[#allocation10 + $0x1b0] sm:$0xff]  ;;  %v146_v21 = vld [vmem:[#allocation10 + $0x120] sm:$0xff] }
  0x34   :  { %252 = vmatpush.msra.mxu0 %v178_v54  ;;  %272 = vmatpush.msra.mxu1 %v179_v55  ;;  %v147_v22 = vld [vmem:[#allocation10 + $0x128] sm:$0xff]  ;;  %v149_v23 = vld [vmem:[#allocation10 + $0x138] sm:$0xff]  ;;  %v160_v24 = vld [vmem:[#allocation10 + $0x190] sm:$0xff] }
  0x35   :  { %312 = vmatpush.msra.mxu3 %v181_v56  ;;  %290 = vmatpush.msra.mxu2 %v188_v57  ;;  %v142_v25 = vld [vmem:[#allocation10 + $0x100] sm:$0xff]  ;;  %v143_v26 = vld [vmem:[#allocation10 + $0x108] sm:$0xff]  ;;  %v145_v27 = vld [vmem:[#allocation10 + $0x118] sm:$0xff] }
  0x36   :  { %253 = vmatpush.msra.mxu0 %v174_v58  ;;  %273 = vmatpush.msra.mxu1 %v175_v59  ;;  %v156_v28 = vld [vmem:[#allocation10 + $0x170] sm:$0xff]  ;;  %v138_v29 = vld [vmem:[#allocation10 + $0xe0] sm:$0xff]  ;;  %v139_v30 = vld [vmem:[#allocation10 + $0xe8] sm:$0xff] }
  0x37   :  { %313 = vmatpush.msra.mxu3 %v177_v60  ;;  %291 = vmatpush.msra.mxu2 %v184_v0  ;;  %v141_v31 = vld [vmem:[#allocation10 + $0xf8] sm:$0xff]  ;;  %v152_v32 = vld [vmem:[#allocation10 + $0x150] sm:$0xff]  ;;  %v134_v33 = vld [vmem:[#allocation10 + $0xc0] sm:$0xff] }
  0x38   :  { %318 = vmatpush.msrb.mxu0 %v170_v61  ;;  %338 = vmatpush.msrb.mxu1 %v171_v62  ;;  %v135_v34 = vld [vmem:[#allocation10 + $0xc8] sm:$0xff]  ;;  %v137_v35 = vld [vmem:[#allocation10 + $0xd8] sm:$0xff]  ;;  %v148_v36 = vld [vmem:[#allocation10 + $0x130] sm:$0xff] }
  0x39   :  { %378 = vmatpush.msrb.mxu3 %v173_v63  ;;  %292 = vmatpush.msra.mxu2 %v180_v4  ;;  %v130_v37 = vld [vmem:[#allocation10 + $0xa0] sm:$0xff]  ;;  %v131_v38 = vld [vmem:[#allocation10 + $0xa8] sm:$0xff]  ;;  %v133_v39 = vld [vmem:[#allocation10 + $0xb8] sm:$0xff] }
  0x3a   :  { %319 = vmatpush.msrb.mxu0 %v166_v1  ;;  %339 = vmatpush.msrb.mxu1 %v167_v2  ;;  %v144_v40 = vld [vmem:[#allocation10 + $0x110] sm:$0xff]  ;;  %v126_v41 = vld [vmem:[#allocation10 + $0x80] sm:$0xff]  ;;  %v127_v42 = vld [vmem:[#allocation10 + $0x88] sm:$0xff] }
  0x3b   :  { %379 = vmatpush.msrb.mxu3 %v169_v3  ;;  %293 = vmatpush.msra.mxu2 %v176_v8  ;;  %v129_v43 = vld [vmem:[#allocation10 + $0x98] sm:$0xff]  ;;  %v103_v44 = vld [vmem:[#allocation7] sm:$0xff]  ;;  %v122_v46 = vld [vmem:[#allocation10 + $0x60] sm:$0xff] }
  0x3c   :  { %320 = vmatpush.msrb.mxu0 %v162_v5  ;;  %340 = vmatpush.msrb.mxu1 %v163_v6  ;;  %v140_v45 = vld [vmem:[#allocation10 + $0xf0] sm:$0xff]  ;;  %v123_v47 = vld [vmem:[#allocation10 + $0x68] sm:$0xff]  ;;  %v125_v48 = vld [vmem:[#allocation10 + $0x78] sm:$0xff] }
  0x3d   :  { %380 = vmatpush.msrb.mxu3 %v165_v7  ;;  %358 = vmatpush.msrb.mxu2 %v172_v12  ;;  %v136_v49 = vld [vmem:[#allocation10 + $0xd0] sm:$0xff]  ;;  %v118_v50 = vld [vmem:[#allocation10 + $0x40] sm:$0xff]  ;;  %v119_v51 = vld [vmem:[#allocation10 + $0x48] sm:$0xff] }
  0x3e   :  { %321 = vmatpush.msrb.mxu0 %v158_v9  ;;  %341 = vmatpush.msrb.mxu1 %v159_v10  ;;  %v121_v52 = vld [vmem:[#allocation10 + $0x58] sm:$0xff]  ;;  %v132_v53 = vld [vmem:[#allocation10 + $0xb0] sm:$0xff]  ;;  %v114_v54 = vld [vmem:[#allocation10 + $0x20] sm:$0xff] }
  0x3f   :  { %381 = vmatpush.msrb.mxu3 %v161_v11  ;;  %359 = vmatpush.msrb.mxu2 %v168_v16  ;;  %v115_v55 = vld [vmem:[#allocation10 + $0x28] sm:$0xff]  ;;  %v117_v56 = vld [vmem:[#allocation10 + $0x38] sm:$0xff]  ;;  %v128_v57 = vld [vmem:[#allocation10 + $0x90] sm:$0xff] }
  0x40   :  { %322 = vmatpush.msrb.mxu0 %v154_v13  ;;  %342 = vmatpush.msrb.mxu1 %v155_v14  ;;  %v110_v58 = vld [vmem:[#allocation10] sm:$0xff]  ;;  %v111_v59 = vld [vmem:[#allocation10 + $0x8] sm:$0xff]  ;;  %v113_v60 = vld [vmem:[#allocation10 + $0x18] sm:$0xff] }
  0x41   :  { %382 = vmatpush.msrb.mxu3 %v157_v15  ;;  %360 = vmatpush.msrb.mxu2 %v164_v20  ;;  %v109_v61 = vld [vmem:[#allocation4] sm:$0xff]  ;;  %v124_v62 = vld [vmem:[#allocation10 + $0x70] sm:$0xff] }
  0x42   :  { %323 = vmatpush.msrb.mxu0 %v150_v17  ;;  %343 = vmatpush.msrb.mxu1 %v151_v18  ;;  %v120_v63 = vld [vmem:[#allocation10 + $0x50] sm:$0xff]  ;;  %v398_v4 = vld [vmem:[%s798_s5] sm:$0xf]  ;;  %s727_s5 = smov [#allocation14]  }
  0x43   :  { %383 = vmatpush.msrb.mxu3 %v153_v19  ;;  %361 = vmatpush.msrb.mxu2 %v160_v24  ;;  %v116_v0 = vld [vmem:[#allocation10 + $0x30] sm:$0xff]  ;;  %v400_v6 = vperm.slane %v398_v4, 0  ;;  %v401_v7 = vperm.slane %v398_v4, 1  ;;  %v403_v17 = vperm.slane %v398_v4, 3  ;;  %s495_s25 = sshll.u32 %s727_s5, 4  ;;  %s496_s25 = int_to_ptr.vmem [resolvable:$true] %s495_s25 }
  0x44   :  { %324 = vmatpush.msrb.mxu0 %v146_v21  ;;  %344 = vmatpush.msrb.mxu1 %v147_v22  ;;  %v112_v1 = vld [vmem:[#allocation10 + $0x10] sm:$0xff] }
  0x45   :  { %384 = vmatpush.msrb.mxu3 %v149_v23  ;;  %362 = vmatpush.msrb.mxu2 %v156_v28  ;;  %v402_v28 = vperm.slane %v398_v4, 2 }
  0x46   :  { %325 = vmatpush.msrb.mxu0 %v142_v25  ;;  %345 = vmatpush.msrb.mxu1 %v143_v26 }
  0x47   :  { %385 = vmatpush.msrb.mxu3 %v145_v27  ;;  %363 = vmatpush.msrb.mxu2 %v152_v32 }
  0x48   :  { %326 = vmatpush.msrb.mxu0 %v138_v29  ;;  %346 = vmatpush.msrb.mxu1 %v139_v30 }
  0x49   :  { %386 = vmatpush.msrb.mxu3 %v141_v31  ;;  %364 = vmatpush.msrb.mxu2 %v148_v36 }
  0x4a   :  { %327 = vmatpush.msrb.mxu0 %v134_v33  ;;  %347 = vmatpush.msrb.mxu1 %v135_v34 }
  0x4b   :  { %387 = vmatpush.msrb.mxu3 %v137_v35  ;;  %365 = vmatpush.msrb.mxu2 %v144_v40 }
  0x4c   :  { %328 = vmatpush.msrb.mxu0 %v130_v37  ;;  %348 = vmatpush.msrb.mxu1 %v131_v38 }
  0x4d   :  { %388 = vmatpush.msrb.mxu3 %v133_v39  ;;  %254 = vmatmul.f32.vlgmr.msra.gmra.mxu0 %v103_v44 }
  0x4e   :  { %329 = vmatpush.msrb.mxu0 %v126_v41  ;;  %349 = vmatpush.msrb.mxu1 %v127_v42 }
  0x4f   :  { %389 = vmatpush.msrb.mxu3 %v129_v43  ;;  %274 = vmatmul.f32.vlgmr.msra.gmra.mxu1 %v103_v44 }
  0x50   :  { %314 = vmatmul.f32.vlgmr.msra.gmra.mxu3 %v103_v44  ;;  %366 = vmatpush.msrb.mxu2 %v140_v45 }
  0x51   :  { %330 = vmatpush.msrb.mxu0 %v122_v46  ;;  %350 = vmatpush.msrb.mxu1 %v123_v47 }
  0x52   :  { %390 = vmatpush.msrb.mxu3 %v125_v48  ;;  %367 = vmatpush.msrb.mxu2 %v136_v49 }
  0x53   :  { %331 = vmatpush.msrb.mxu0 %v118_v50  ;;  %351 = vmatpush.msrb.mxu1 %v119_v51  ;;  %v105_v50 = vld [vmem:[#allocation9] sm:$0xff] }
  0x54   :  { %391 = vmatpush.msrb.mxu3 %v121_v52  ;;  %368 = vmatpush.msrb.mxu2 %v132_v53 }
  0x55   :  { %332 = vmatpush.msrb.mxu0 %v114_v54  ;;  %352 = vmatpush.msrb.mxu1 %v115_v55 }
  0x56   :  { %392 = vmatpush.msrb.mxu3 %v117_v56  ;;  %369 = vmatpush.msrb.mxu2 %v128_v57 }
  0x57   :  { %294 = vmatmul.f32.vlgmr.msra.gmra.mxu2 %v103_v44  ;;  %333 = vmatpush.msrb.mxu0 %v110_v58 }
  0x58   :  { %353 = vmatpush.msrb.mxu1 %v111_v59  ;;  %393 = vmatpush.msrb.mxu3 %v113_v60 }
  0x59   :  { %334 = vmatmul.f32.vlgmr.msrb.gmra.mxu0 %v109_v61  ;;  %354 = vmatmul.f32.vlgmr.msrb.gmra.mxu1 %v109_v61 }
  0x5a   :  { %370 = vmatpush.msrb.mxu2 %v124_v62  ;;  %394 = vmatmul.f32.vlgmr.msrb.gmra.mxu3 %v109_v61 }
  0x5c   :  { %371 = vmatpush.msrb.mxu2 %v120_v63 }
  0x5e   :  { %372 = vmatpush.msrb.mxu2 %v116_v0 }
  0x60   :  { %373 = vmatpush.msrb.mxu2 %v112_v1 }
  0x61   :  { %374 = vmatmul.f32.vlgmr.msrb.gmra.mxu2 %v109_v61 }
  0xca   :  { %v255_v2 = vpop.f32.mrf.mxu0 }
  0xcc   :  { %v275_v3 = vpop.f32.mrf.mxu1 }
  0xd3   :  { %v315_v5 = vpop.f32.mrf.mxu3 }
  0xd6   :  { %v335_v8 = vpop.f32.mrf.mxu0  ;;  %v355_v9 = vpop.f32.mrf.mxu1 }
  0xd7   :  { %v336_v10 = vadd.f32 %v335_v8, %v255_v2  ;;  %v356_v11 = vadd.f32 %v355_v9, %v275_v3 }
  0xd9   :  { %v408_v12 = vadd.f32 %v400_v6, %v336_v10  ;;  %v409_v13 = vadd.f32 %v401_v7, %v356_v11 }
  0xda   :  { %v295_v16 = vpop.f32.mrf.mxu2 }
  0xdb   :  { %v514_v14 = vmul.f32 -1.442695, %v408_v12  ;;  %v515_v15 = vmul.f32 -1.442695, %v409_v13 }
  0xdd   :  { %526 = vpow2.f32 %v514_v14  ;;  %v395_v18 = vpop.f32.mrf.mxu3 }
  0xde   :  { %528 = vpow2.f32 %v515_v15  ;;  %v396_v19 = vadd.f32 %v395_v18, %v315_v5 }
  0xe0   :  { %v411_v20 = vadd.f32 %v403_v17, %v396_v19 }
  0xe2   :  { %v516_v21 = vmul.f32 -1.442695, %v411_v20 }
  0xe3   :  { %v527_v22 = vpop.eup %526 }
  0xe4   :  { %v529_v23 = vpop.eup %528  ;;  %v415_v24 = vadd.f32 1.0, %v527_v22  ;;  %530 = vpow2.f32 %v516_v21  ;;  %v375_v26 = vpop.f32.mrf.mxu2 }
  0xe5   :  { %v434_v25 = vadd.f32 1.0, %v529_v23  ;;  %v376_v27 = vadd.f32 %v375_v26, %v295_v16 }
  0xe6   :  { %532 = vrcp.f32 %v415_v24  ;;  %v427_v38 = vand.u32 2147483648, %v415_v24  ;;  %v425_v41 = vand.u32 2147483647, %v415_v24  ;;  %vm421_vm2 = vweird.f32 %v415_v24 }
  0xe7   :  { %534 = vrcp.f32 %v434_v25  ;;  %v410_v32 = vadd.f32 %v402_v28, %v376_v27  ;;  %v446_v39 = vand.u32 2147483648, %v434_v25  ;;  %v444_v43 = vand.u32 2147483647, %v434_v25 }
  0xe8   :  { %vm440_vm3 = vweird.f32 %v434_v25  ;;  %v428_v46 = vor.u32 1.1754944e-38, %v427_v38  ;;  %vm426_vm6 = vcmp.eq.f32.partialorder %v425_v41, 8.507059e+37 }
  0xe9   :  { %v447_v49 = vor.u32 1.1754944e-38, %v446_v39  ;;  %vm445_vm7 = vcmp.eq.f32.partialorder %v444_v43, 8.507059e+37 }
  0xea   :  { %v531_v29 = vpop.eup %530 }
  0xeb   :  { %v454_v30 = vadd.f32 1.0, %v531_v29 }
  0xec   :  { %v533_v31 = vpop.eup %532 }
  0xed   :  { %v535_v33 = vpop.eup %534  ;;  %v417_v34 = vmul.f32 %v533_v31, %v415_v24  ;;  %536 = vrcp.f32 %v454_v30  ;;  %vm422_vm0 = vweird.f32 %v533_v31  ;;  %v466_v62 = vand.u32 2147483648, %v454_v30 }
  0xee   :  { %v436_v35 = vmul.f32 %v535_v33, %v434_v25  ;;  %538 = vtanh.f32 %v410_v32  ;;  %vm441_vm1 = vweird.f32 %v535_v33  ;;  %vm423_vm4 = vmor %vm421_vm2, %vm422_vm0  ;;  %vm460_vm9 = vweird.f32 %v454_v30 }
  0xef   :  { %v418_v36 = vsub.f32 1.0, %v417_v34  ;;  %vm442_vm5 = vmor %vm440_vm3, %vm441_vm1  ;;  %v464_v63 = vand.u32 2147483647, %v454_v30  ;;  %v467_v1 = vor.u32 1.1754944e-38, %v466_v62 }
  0xf0   :  { %v437_v37 = vsub.f32 1.0, %v436_v35 }
  0xf1   :  { %v419_v40 = vmul.f32 %v533_v31, %v418_v36  ;;  %vm465_vm11 = vcmp.eq.f32.partialorder %v464_v63, 8.507059e+37 }
  0xf2   :  { %v438_v42 = vmul.f32 %v535_v33, %v437_v37 }
  0xf3   :  { %v537_v44 = vpop.eup %536  ;;  %v420_v45 = vadd.f32 %v533_v31, %v419_v40 }
  0xf4   :  { %v439_v47 = vadd.f32 %v535_v33, %v438_v42  ;;  %v456_v48 = vmul.f32 %v537_v44, %v454_v30  ;;  %v539_v52 = vpop.eup %538  ;;  %vm461_vm8 = vweird.f32 %v537_v44 }
  0xf5   :  { %v424_v51 = vsel %vm423_vm4, %v533_v31, %v420_v45  ;;  %vm462_vm10 = vmor %vm460_vm9, %vm461_vm8 }
  0xf6   :  { %v429_v53 = vsel %vm426_vm6, %v428_v46, %v424_v51  ;;  %v443_v54 = vsel %vm442_vm5, %v535_v33, %v439_v47  ;;  %v457_v55 = vsub.f32 1.0, %v456_v48 }
  0xf7   :  { %v448_v56 = vsel %vm445_vm7, %v447_v49, %v443_v54  ;;  %v471_v57 = vmul.f32 %v539_v52, %v429_v53 }
  0xf8   :  { %v470_v58 = vmul.f32 %v448_v56, %v105_v50  ;;  %v458_v59 = vmul.f32 %v537_v44, %v457_v55 }
  0xfa   :  { %v472_v60 = vadd.f32 %v471_v57, %v470_v58  ;;  %v459_v61 = vadd.f32 %v537_v44, %v458_v59 }
  0xfc   :  { %478 = vst [vmem:[#allocation14] sm:$0xff] %v472_v60  ;;  %540 = vtanh.f32 %v472_v60  ;;  %v463_v0 = vsel %vm462_vm10, %v537_v44, %v459_v61 }
  0xfd   :  { %500 = dma.vmem_to_hbm [thread:$0]  %s496_s25, 128, %s498_s28, [#allocation15]   ;;  %v468_v3 = vsel %vm465_vm11, %v467_v1, %v463_v0 }
 0x102   :  { %v541_v2 = vpop.eup %540 }
 0x103   :  { %v474_v4 = vmul.f32 %v541_v2, %v468_v3 }
 0x105   :  { %477 = vst [vmem:[#allocation13] sm:$0xff] %v474_v4 }
 0x106   :  { %489 = dma.vmem_to_hbm [thread:$0]  %s485_s30, 128, %s487_s9, [#allocation6]  }
 0x107   :  { %716 = dma.done.wait [#allocation6], 128  }
 0x108   :  { %717 = vsyncadd [#allocation6], 4294967168 }
 0x109   :  { %718 = dma.done.wait [#allocation15], 128  }
 0x10a   :  { %719 = vsyncadd [#allocation15], 4294967168 }
 0x10b   :  { %509 = vsyncpa [#allocation5], 1 }
 0x10c   :  { %510 = vsyncpa [#allocation8], 1 }
 0x10d   :  { %511 = vsyncpa [#allocation11], 1 }
 0x10e   :  { %512 = vsyncpa [#allocation6], 1 }
 0x10f   :  { %513 = vsyncpa [#allocation15], 1 }

</bundles_post_ra>
